<compile_context>
chip_gen: v5e
topology: v5e:2x2
jax: 0.10.0
libtpu: 0.0.40
codegen_flags: <defaults>
</compile_context>

<pallas_src>
import functools
import math

import jax
import jax.numpy as jnp
from jax.experimental import pallas as pl
from jax.experimental.pallas import tpu as pltpu


def make_positional_encoding_table(max_seq_length: int, d_model: int,
                                   dtype=jnp.float32) -> jax.Array:
    """Deterministic pe buffer, identical to the PyTorch __init__ math."""
    position = jnp.arange(0, max_seq_length, dtype=jnp.float32)[:, None]      # (L, 1)
    div_term = jnp.exp(jnp.arange(0, d_model, 2, dtype=jnp.float32)
                       * (-math.log(10000.0) / d_model))                      # (D/2,)
    pe = jnp.zeros((max_seq_length, d_model), dtype=jnp.float32)
    pe = pe.at[:, 0::2].set(jnp.sin(position * div_term))
    pe = pe.at[:, 1::2].set(jnp.cos(position * div_term))
    return pe.astype(dtype)


# ---------------------------------------------------------------------------
# Kernels
# ---------------------------------------------------------------------------

def _pe_tile(pe_ref, row_tile: int, pe_slice: bool):
    """Current seq-tile's pe rows.

    pe_slice=True  -> pe_ref holds the whole (S, D) table resident in VMEM;
                      dynamically slice the rows of the current seq tile.
    pe_slice=False -> pe_ref already is the (row_tile, D) tile for this step.
    """
    if pe_slice:
        start = pl.multiple_of(pl.program_id(0) * row_tile, row_tile)
        return pe_ref[pl.ds(start, row_tile), :]
    return pe_ref[...]


def _pe_add_kernel(x_ref, pe_ref, o_ref, *, row_tile: int, pe_slice: bool):
    # x_ref / o_ref: (row_tile, D) tiles (batch dim squeezed by BlockSpec).
    o_ref[...] = (x_ref[...] + _pe_tile(pe_ref, row_tile, pe_slice)).astype(o_ref.dtype)


def _pe_add_dropout_kernel(x_ref, pe_ref, bits_ref, o_ref, *,
                           row_tile: int, pe_slice: bool,
                           threshold: int, scale: float):
    # Inverted dropout with uint8 bits: drop iff bits < round(p * 256).
    # Integer-domain compare; single fused scale multiply on the keep path.
    y = x_ref[...] + _pe_tile(pe_ref, row_tile, pe_slice)
    keep = bits_ref[...].astype(jnp.int32) >= threshold
    o_ref[...] = jnp.where(keep, y * jnp.asarray(scale, y.dtype),
                           jnp.zeros((), y.dtype)).astype(o_ref.dtype)


# ---------------------------------------------------------------------------
# Wrapper
# ---------------------------------------------------------------------------

def _pick_row_tile(seq_len: int, row_bytes: int, target_block_bytes: int) -> int:
    """Largest seq-row tile <= ~target_block_bytes per stream.

    Row count is a multiple of 32 (lcm of the sublane packing for f32 (8),
    bf16 (16) and the uint8 dropout bits (32)), or the full seq extent if the
    whole sequence already fits.
    """
    sub = 32
    tr = max(sub, (target_block_bytes // max(row_bytes, 1)) // sub * sub)
    return seq_len if seq_len <= tr else tr


def positional_encoding(x: jax.Array, pe: jax.Array, *,
                        p: float = 0.1, training: bool = False,
                        rng_key: jax.Array | None = None,
                        target_block_bytes: int = 2 << 20,
                        vmem_limit_bytes: int = 48 << 20,
                        fuse_eval_in_xla: bool = True) -> jax.Array:
    """x: (B, S, D); pe: (max_seq_length >= S, D). Returns (B, S, D)."""
    B, S, D = x.shape
    assert pe.shape[0] >= S and pe.shape[1] == D
    assert 0.0 <= float(p) < 1.0
    pe_s = pe[:S, :].astype(x.dtype)

    use_dropout = bool(training) and float(p) > 0.0
    if not use_dropout and fuse_eval_in_xla:
        # Eval path: dropout is identity and the broadcast add is trivially
        # fusible — leave it to XLA so the consumer absorbs it (no extra HBM
        # round trip through a standalone Pallas call).
        return x + pe_s[None, :, :]

    itemsize = x.dtype.itemsize
    tr = _pick_row_tile(S, D * itemsize, target_block_bytes)
    n_row_tiles = pl.cdiv(S, tr)

    # Keep pe fully resident in VMEM (single block, constant index map) when it
    # is small and the row tile divides S (so the in-kernel slice never runs
    # past the block).  Otherwise tile pe along seq like x.
    pe_resident = (S % tr == 0) and (pe_s.size * pe_s.dtype.itemsize <= (4 << 20))
    pe_slice = pe_resident and n_row_tiles > 1

    # Grid: (seq tiles, batch) with batch INNER so pe's block index is constant
    # across consecutive steps (no redundant pe re-DMA). Both axes independent.
    grid = (n_row_tiles, B)
    x_spec = pl.BlockSpec((None, tr, D), lambda s, b: (b, s, 0))       # squeezed batch
    out_spec = pl.BlockSpec((None, tr, D), lambda s, b: (b, s, 0))
    if pe_resident:
        pe_spec = pl.BlockSpec((S, D), lambda s, b: (0, 0))
    else:
        pe_spec = pl.BlockSpec((tr, D), lambda s, b: (s, 0))

    compiler_params = pltpu.CompilerParams(
        dimension_semantics=("parallel", "parallel"),
        vmem_limit_bytes=vmem_limit_bytes)

    if use_dropout:
        if rng_key is None:
            rng_key = jax.random.PRNGKey(0)
        # uint8 mask bits: 4x less HBM traffic than uint32; 1/256 probability
        # resolution is ample for dropout.
        # TODO(synk): PyTorch's CUDA dropout RNG stream has no Pallas equivalent;
        # ideally the bits would be drawn in-kernel with pltpu.prng_seed /
        # prng_random_bits (seed mixed with pl.program_id(0)/(1)) to remove this
        # stream entirely, but that path does not lower in this environment.
        bits = jax.random.bits(rng_key, (B, S, D), dtype=jnp.uint8)
        threshold = int(round(float(p) * 256.0))
        kernel = functools.partial(
            _pe_add_dropout_kernel, row_tile=tr, pe_slice=pe_slice,
            threshold=threshold, scale=1.0 / (1.0 - float(p)))
        in_specs = [x_spec, pe_spec,
                    pl.BlockSpec((None, tr, D), lambda s, b: (b, s, 0))]
        args = (x, pe_s, bits)
    else:
        kernel = functools.partial(_pe_add_kernel, row_tile=tr, pe_slice=pe_slice)
        in_specs = [x_spec, pe_spec]
        args = (x, pe_s)

    return pl.pallas_call(
        kernel,
        out_shape=jax.ShapeDtypeStruct((B, S, D), x.dtype),
        grid=grid,
        in_specs=in_specs,
        out_specs=out_spec,
        compiler_params=compiler_params,
    )(*args)


# ---------------------------------------------------------------------------
# Demo / self-check
# ---------------------------------------------------------------------------

if __name__ == "__main__":
    # Small shapes consistent with the module's (batch, seq_len, d_model) input.
    B, S, D = 2, 8, 32
    MAX_SEQ = 64

    key = jax.random.PRNGKey(0)
    x = jax.random.normal(key, (B, S, D), dtype=jnp.float32)
    pe = make_positional_encoding_table(MAX_SEQ, D)
    ref = x + pe[:S, :][None, :, :]

    # Training-mode forward (dropout active) -> the Pallas kernel path.
    p = 0.1
    drop_key = jax.random.PRNGKey(1234)
    out_tr = jax.block_until_ready(
        positional_encoding(x, pe, p=p, training=True, rng_key=drop_key))
    bits_ref = jax.random.bits(drop_key, (B, S, D), dtype=jnp.uint8)
    keep_ref = bits_ref.astype(jnp.int32) >= int(round(p * 256.0))
    ref_tr = jnp.where(keep_ref, ref * (1.0 / (1.0 - p)), 0.0)
    assert jnp.allclose(out_tr, ref_tr, atol=1e-6), "training-mode mismatch"

    # Eval mode, default path: plain broadcast add left to XLA fusion.
    out_ev = jax.block_until_ready(positional_encoding(x, pe, p=p, training=False))
    assert jnp.allclose(out_ev, ref, atol=1e-6), "eval-mode (fused) mismatch"

    # Eval mode through the Pallas add kernel (exercises the second kernel).
    out_ev_pl = jax.block_until_ready(
        positional_encoding(x, pe, p=p, training=False, fuse_eval_in_xla=False))
    assert jnp.allclose(out_ev_pl, ref, atol=1e-6), "eval-mode (pallas) mismatch"

    print("KERNEL_OK")
</pallas_src>

<mosaic_0001>
module attributes {stable_mosaic.version = 11 : i64} {
  func.func @_pe_add_dropout_kernel(%arg0: i32, %arg1: i32, %arg2: memref<1x8x32xf32, #tpu.memory_space<vmem>>, %arg3: memref<8x32xf32, #tpu.memory_space<vmem>>, %arg4: memref<1x8x32xi8, #tpu.memory_space<vmem>>, %arg5: memref<1x8x32xf32, #tpu.memory_space<vmem>>) attributes {dimension_semantics = [#tpu.dimension_semantics<parallel>, #tpu.dimension_semantics<parallel>], iteration_bounds = array<i64: 1, 2>, scalar_prefetch = 0 : i64, scratch_operands = 0 : i64, tpu.core_type = #tpu.core_type<tc>, window_params = [{transform_indices = @transform_0, window_bounds = array<i64: 1, 8, 32>}, {pipeline_mode = #tpu.pipeline_mode<synchronous>, transform_indices = @transform_1, window_bounds = array<i64: 8, 32>}, {transform_indices = @transform_2, window_bounds = array<i64: 1, 8, 32>}, {transform_indices = @transform_3, window_bounds = array<i64: 1, 8, 32>}]} {
    %c0 = arith.constant 0 : index
    %c0_0 = arith.constant 0 : index
    %c0_1 = arith.constant 0 : index
    %0 = vector.load %arg2[%c0, %c0_0, %c0_1] : memref<1x8x32xf32, #tpu.memory_space<vmem>>, vector<1x8x32xf32>
    %1 = vector.shape_cast %0 : vector<1x8x32xf32> to vector<8x32xf32>
    %c0_2 = arith.constant 0 : index
    %c0_3 = arith.constant 0 : index
    %2 = vector.load %arg3[%c0_2, %c0_3] : memref<8x32xf32, #tpu.memory_space<vmem>>, vector<8x32xf32>
    %3 = arith.addf %1, %2 : vector<8x32xf32>
    %c0_4 = arith.constant 0 : index
    %c0_5 = arith.constant 0 : index
    %c0_6 = arith.constant 0 : index
    %4 = vector.load %arg4[%c0_4, %c0_5, %c0_6] : memref<1x8x32xi8, #tpu.memory_space<vmem>>, vector<1x8x32xi8>
    %5 = vector.shape_cast %4 : vector<1x8x32xi8> to vector<8x32xi8>
    %6 = arith.extui %5 : vector<8x32xi8> to vector<8x32xi32>
    %c26_i32 = arith.constant 26 : i32
    %7 = vector.broadcast %c26_i32 : i32 to vector<8x32xi32>
    %8 = arith.cmpi sge, %6, %7 : vector<8x32xi32>
    %cst = arith.constant 1.11111116 : f32
    %9 = vector.broadcast %cst : f32 to vector<8x32xf32>
    %10 = arith.mulf %3, %9 : vector<8x32xf32>
    %cst_7 = arith.constant 0.000000e+00 : f32
    %11 = vector.broadcast %cst_7 : f32 to vector<8x32xf32>
    %12 = arith.select %8, %10, %11 : vector<8x32xi1>, vector<8x32xf32>
    %c0_8 = arith.constant 0 : index
    %c0_9 = arith.constant 0 : index
    %c0_10 = arith.constant 0 : index
    %13 = vector.load %arg5[%c0_8, %c0_9, %c0_10] : memref<1x8x32xf32, #tpu.memory_space<vmem>>, vector<1x8x32xf32>
    %14 = vector.shape_cast %13 : vector<1x8x32xf32> to vector<8x32xf32>
    %15 = vector.shape_cast %12 : vector<8x32xf32> to vector<1x8x32xf32>
    tpu.vector_store %arg5[%c0_8, %c0_9, %c0_10], %15 {strides = array<i32>} : memref<1x8x32xf32, #tpu.memory_space<vmem>>, vector<1x8x32xf32>,
    return
  }
  func.func @transform_0(%arg0: i32, %arg1: i32) -> (i32, i32, i32) {
    %c0_i32 = arith.constant 0 : i32
    %c0_i32_0 = arith.constant 0 : i32
    return %arg1, %arg0, %c0_i32 : i32, i32, i32
  }
  func.func @transform_1(%arg0: i32, %arg1: i32) -> (i32, i32) {
    %c0_i32 = arith.constant 0 : i32
    %c0_i32_0 = arith.constant 0 : i32
    %c0_i32_1 = arith.constant 0 : i32
    return %c0_i32, %c0_i32_0 : i32, i32
  }
  func.func @transform_2(%arg0: i32, %arg1: i32) -> (i32, i32, i32) {
    %c0_i32 = arith.constant 0 : i32
    %c0_i32_0 = arith.constant 0 : i32
    return %arg1, %arg0, %c0_i32 : i32, i32, i32
  }
  func.func @transform_3(%arg0: i32, %arg1: i32) -> (i32, i32, i32) {
    %c0_i32 = arith.constant 0 : i32
    %c0_i32_0 = arith.constant 0 : i32
    return %arg1, %arg0, %c0_i32 : i32, i32, i32
  }
}

</mosaic_0001>

<bundles_post_ra>
// kernel: tpu_custom_call.1
= control target key start
LH: loop header
LB: loop body
LE: loop exit
PB: predicated region body
PF: predicated region fallthrough
CT: control target
= control target key end

     0   :  { %8 = vsyncpa [#allocation3], 0  ;;  %s870_s0 = inlined_call_operand.hbm [shape: f32[2,8,32], index: 0, kind: input, shape index: {}]   ;;  %s871_s1 = inlined_call_operand.hbm [shape: f32[8,32], index: 1, kind: input, shape index: {}]   ;;  %s872_s2 = inlined_call_operand.hbm [shape: u8[2,8,32], index: 2, kind: input, shape index: {}]   ;;  %s873_s3 = inlined_call_operand.hbm [shape: f32[2,8,32], index: 3, kind: output, shape index: {}]  }
   0x1   :  { %10 = vsyncpa [#allocation3 + $0x1], 0 }
   0x2   :  { %11 = vsyncpa [#allocation6], 0 }
   0x3   :  { %12 = vsyncpa [#allocation4], 0 }
   0x4   :  { %14 = vsyncpa [#allocation4 + $0x1], 0  ;;  %s697_s12 = smov 0   ;;  %s699_s13 = smov 0  }
   0x5   :  { %s701_s14 = smov 0   ;;  %s703_s15 = smov 0  }
   0x6   :  { %s705_s16 = smov 0   ;;  %s707_s17 = smov 0  }
   0x7 LB: > { %s29_s18 = sadd.s32 1, %s670_s16  ;;  %s41_s19 = sadd.s32 1, %s662_s14  ;;  %s674_s17 = sphi %s707_s17, %s20_s17   ;;  %s670_s16 = sphi %s705_s16, %s884_s16   ;;  %s666_s15 = sphi %s703_s15, %s883_s15   ;;  %s662_s14 = sphi %s701_s14, %s882_s14   ;;  %s658_s13 = sphi %s699_s13, %s881_s13   ;;  %s654_s12 = sphi %s697_s12, %s880_s12  }
   0x8   : > { %p30_p0 = scmp.ge.s32.totalorder %s29_s18, 2  ;;  %p48_p1 = scmp.ne.s32.totalorder %s662_s14, %s658_s13 }
   0x9   : > { %p49_p2 = scmp.eq.s32.totalorder %s674_s17, 0  ;;  %p402_p3 = scmp.ge.s32.totalorder %s674_s17, 2 }
   0xa   : > { %s886_s18 = smov (%p30_p0, %s29_s18), 0  ;;  %p442_p5 = scmp.lt.s32.totalorder %s674_s17, 2 }
   0xb   : > { %p738_p4 = por %p49_p2, %p48_p1  ;;  %s36_s21 = ssub.s32 %s670_s16, %s886_s18 }
   0xc   : > { %s167_s22 = sand.u32 1, %s674_s17   ;;  %p39_p6 = scmp.eq.s32.totalorder %s36_s21, 0 }
   0xd   : > { %s169_s23 = sand.u32 1, %s662_s14   ;;  %s404_s24 = sshll.u32 %s670_s16, 3 }
   0xe   : > { %s749_s25 = scalar_select %p39_p6, %s662_s14, %s41_s19  }
   0xf   : > { %s403_s26 = sshll.u32 %s169_s23, 3  ;;  %s176_s29 = scalar_lea.hbm %s870_s0, %s404_s24 }
  0x10   : > { %s178_s30 = sshll.u32 %s176_s29, 4  ;;  %s171_s4 = scalar_lea.vmem [#allocation2], %s403_s26  ;;  %s179_s30 = int_to_ptr.hbm [resolvable:$true] %s178_s30 }
  0x11   : > { %s180_s5 = sshll.u32 %s171_s4, 4  ;;  %p758_p7 = pnand %p442_p5, %p738_p4  ;;  %s181_s5 = int_to_ptr.vmem [resolvable:$true] %s180_s5 }
  0x12   : > { %s405_s7 = sshll.u32 %s169_s23, 1  ;;  %s762_s8 = scalar_lea.sflag [#allocation3], %s167_s22 }
  0x13   : > { %433 = dma.hbm_to_vmem [thread:$0]  (!%p758_p7), %s179_s30, 128, %s181_s5, %s762_s8  }
  0x14   : > { %s768_s9 = sadd.s32 4294967295, %s674_s17   ;;  %s399_s10 = sadd.s32 4294967294, %s674_s17  }
  0x15   : > { %p54_p8 = scmp.ne.s32.totalorder %s658_s13, %s654_s12  ;;  %p55_p9 = scmp.eq.s32.totalorder %s768_s9, 0 }
  0x16   : > { %p129_p10 = scmp.eq.s32.totalorder %s768_s9, 1  ;;  %p135_p11 = scmp.eq.s32.totalorder %s399_s10, 1 }
  0x17   : > { %p777_p12 = por %p55_p9, %p54_p8  ;;  %p400_p13 = scmp.ge.s32.totalorder %s674_s17, 1 }
  0x18   : > { %p785_p0 = por %p129_p10, %p48_p1  ;;  %p789_p2 = por %p135_p11, %p54_p8 }
  0x19   : > { %p142_p4 = scmp.lt.s32.totalorder %s674_s17, 3  ;;  %s154_s23 = sshll.u32 %s871_s1, 4  ;;  %s155_s23 = int_to_ptr.hbm [resolvable:$true] %s154_s23 }
  0x1a   : > { %s676_s26 = smov [#allocation5]   ;;  %s406_s28 = sshll.u32 %s670_s16, 1 }
  0x1b   : > { %p797_p5 = pnand %p400_p13, %p142_p4  ;;  %s156_s27 = sshll.u32 %s676_s26, 4  ;;  %s157_s27 = int_to_ptr.vmem [resolvable:$true] %s156_s27 }
  0x1c   : > { %s191_s29 = scalar_lea.vmem [#allocation7], %s405_s7  ;;  %s196_s10 = scalar_lea.hbm %s872_s2, %s406_s28 }
  0x1d   : > { %p426_p1 = pneg %p797_p5  ;;  %s200_s30 = sshll.u32 %s191_s29, 4  ;;  %s201_s30 = int_to_ptr.vmem [resolvable:$true] %s200_s30 }
  0x1e   : > { %s198_s21 = sshll.u32 %s196_s10, 4  ;;  %209 = sbr.rel (%p797_p5) target bundleno = 58 (0x3a), region = 32  ;;  %s199_s21 = int_to_ptr.hbm [resolvable:$true] %s198_s21 }
  0x1f   : > { %p427_p6 = pnand %p426_p1, %p55_p9  ;;  %s211_s7 = sand.u32 (!%p797_p5), 1, %s768_s9  }
  0x20   : > { %436 = dma.hbm_to_vmem [thread:$0]  (!%p758_p7), %s199_s21, 32, %s201_s30, %s762_s8  }
  0x21   : > { %429 = dma.hbm_to_vmem [thread:$0]  (!%p427_p6), %s155_s23, 128, %s157_s27, [#allocation6]  }
  0x22   : > { %s816_s22 = sand.u32 (!%p797_p5), 1, %s658_s13   ;;  %s212_s29 = scalar_lea.sflag (!%p797_p5), [#allocation3], %s211_s7 }
  0x23   : > { %s408_s26 = sshll.u32 %s816_s22, 3 }
  0x24   : > { %s215_s4 = scalar_lea.vmem [#allocation2], %s408_s26 }
  0x25   : > { %637 = dma.done.wait (%p777_p12), %s212_s29, 128  }
  0x26   : > { %639 = vsyncadd (%p777_p12), %s212_s29, 4294967168 }
  0x27   : > { %641 = dma.done.wait (%p55_p9), [#allocation6], 128  }
  0x28   : > { %643 = vsyncadd (%p55_p9), [#allocation6], 4294967168  ;;  %s410_s6 = sshll.u32 %s816_s22, 1 }
  0x29   : > { %s230_s8 = scalar_lea.vmem [#allocation7], %s410_s6 }
  0x2a   : > { %645 = dma.done.wait (%p777_p12), %s212_s29, 32  }
  0x2b   : > { %647 = vsyncadd (%p777_p12), %s212_s29, 4294967264  ;;  %s413_s23 = sshll.u32 %s666_s15, 3  ;;  %v259_v0 = vld [vmem:[%s215_s4] sm:$0xff]  ;;  %v260_v1 = vld [vmem:[#allocation5] sm:$0xff]  ;;  %s258_s9 = scalar_lea.vmem [#allocation8], %s408_s26  ;;  %vm268_vm0 = vcmask 261120  }
  0x2c   : > { %s282_s28 = scalar_lea.hbm %s873_s3, %s413_s23  ;;  %v262_v2 = vld [vmem:[%s230_s8] sm:$0x3]  ;;  %v261_v3 = vadd.f32 %v260_v1, %v259_v0  ;;  %s284_s30 = sshll.u32 %s258_s9, 4  ;;  %s285_s30 = int_to_ptr.vmem [resolvable:$true] %s284_s30 }
  0x2d   : > { %v263_v4 = vunpack.c.0.s8 %v262_v2  ;;  %s286_s5 = sshll.u32 %s282_s28, 4  ;;  %s271_s15 = scalar_lea.sflag [#allocation4], %s816_s22  ;;  %s287_s5 = int_to_ptr.hbm [resolvable:$true] %s286_s5 }
  0x2e   : > { %v266_v6 = vmul.f32 1.1111112, %v261_v3  ;;  %s598_s11 = sshra.s32 %s287_s5, 4  ;;  %s604_s26 = scalar_lea.hbm %s873_s3, 16  ;;  %s599_s11 = int_to_ptr.hbm [resolvable:$true] %s598_s11 }
  0x2f   : > { %v264_v5 = vand.u32 255, %v263_v4  ;;  %s600_s10 = scalar_lea.hbm %s599_s11, 8  ;;  %p605_p10 = scmp.lt.s32.totalorder %s599_s11, %s873_s3 }
  0x30   : > { %p601_p7 = scmp.ne.s32.totalorder %s599_s11, %s600_s10  ;;  %p606_p11 = scmp.lt.s32.totalorder %s604_s26, %s600_s10 }
  0x31   : > { %vm265_vm1 = vcmp.ge.s32.totalorder %v264_v5, 26 }
  0x32   : > { %v267_v7 = vsel %vm265_vm1, %v266_v6, 0.0  ;;  %p602_p8 = pnand %p601_p7, %p785_p0  ;;  %p607_p12 = por %p606_p11, %p605_p10 }
  0x33   : > { %269 = vst.msk [vmem:[%s258_s9] sm:$0xff] %vm268_vm0, %v267_v7 }
  0x34   : > { %p603_p9 = pneg %p602_p8 }
  0x36   : > { %p608_p13 = pnand %p607_p12, %p603_p9 }
  0x38   : > { %611 = shalt.err (!%p608_p13)
}
  0x39   : > { %424 = dma.vmem_to_hbm [thread:$0]  (%p785_p0), %s285_s30, 128, %s287_s5, %s271_s15  }
  0x3a PF: > { %s298_s22 = sand.u32 1, %s654_s12   ;;  %p438_p4 = pnand %p402_p3, %p789_p2 }
  0x3b   : > { %s299_s6 = scalar_lea.sflag [#allocation4], %s298_s22 }
  0x3c   : > { %p439_p5 = pneg %p438_p4 }
  0x3e   : > { %649 = dma.done.wait (%p439_p5), %s299_s6, 128  }
  0x3f   : > { %651 = vsyncadd (%p439_p5), %s299_s6, 4294967168  ;;  %s20_s17 = sadd.s32 1, %s674_s17   ;;  %s880_s12 = smov %s658_s13 }
  0x40   : > { %p17_p1 = scmp.ge.s32.totalorder %s20_s17, 4   ;;  %s881_s13 = smov %s662_s14 }
  0x41   : > { %s882_s14 = smov %s749_s25  ;;  %s883_s15 = smov %s670_s16 }
  0x42   : > { %s884_s16 = smov %s886_s18  ;;  %19 = sbr.rel (!%p17_p1) target bundleno = 7 (0x7), region = 92 }
  0x47   :  { %305 = vsyncpa [#allocation3], 1 }
  0x48   :  { %307 = vsyncpa [#allocation3 + $0x1], 1 }
  0x49   :  { %308 = vsyncpa [#allocation6], 1 }
  0x4a   :  { %309 = vsyncpa [#allocation4], 1 }
  0x4b   :  { %311 = vsyncpa [#allocation4 + $0x1], 1 }

</bundles_post_ra>
